<compile_context>
chip_gen: v6e
topology: v6e:2x2x1
jax: 0.10.0
libtpu: 0.0.40
codegen_flags: <defaults>
</compile_context>

<pallas_src>
import functools

import jax
import jax.numpy as jnp
from jax.experimental import pallas as pl
from jax.experimental.pallas import tpu as pltpu


def _self_output_kernel(x_ref, res_ref, w_ref, p_ref, o_ref, *, eps):
    # x_ref:   (TM, H)  tile of hidden_states rows
    # res_ref: (TM, H)  tile of input_tensor (residual)
    # w_ref:   (H, H)   dense weight in [in, out] layout (VMEM-resident)
    # p_ref:   (3, H)   packed f32 params: row 0 = bias, row 1 = gamma, row 2 = beta
    #
    # Dense: canonical contraction, native-dtype MXU operands, f32 accumulation.
    h = jnp.dot(x_ref[...], w_ref[...], preferred_element_type=jnp.float32)

    # Dropout: eval-mode identity (nn.Dropout is a no-op in eval).

    bias = p_ref[0:1, :]
    gamma = p_ref[1:2, :]
    beta = p_ref[2:3, :]

    y = h + bias + res_ref[...].astype(jnp.float32)

    # One-pass LayerNorm statistics (f32), matching (x - u) / sqrt(var + eps) * g + b.
    mean = jnp.mean(y, axis=-1, keepdims=True)
    mean_sq = jnp.mean(y * y, axis=-1, keepdims=True)
    var = jnp.maximum(mean_sq - mean * mean, 0.0)   # clamp cancellation
    inv = jax.lax.rsqrt(var + eps)
    out = (y - mean) * inv * gamma + beta
    o_ref[...] = out.astype(o_ref.dtype)


def _round_up(x, m):
    return ((x + m - 1) // m) * m


def self_output(hidden_states, input_tensor, weight, bias, gamma, beta,
                *, eps=1e-12, row_tile=None):
    """hidden_states, input_tensor: [B, S, H]; weight: [H, H] in PyTorch [out, in] layout;
    bias, gamma, beta: [H]."""
    B, S, H = hidden_states.shape
    rows = B * S

    # One-time HBM transpose of the weight to [in, out]; negligible vs a per-step
    # in-kernel transpose of the same HxH tile.
    w_t = weight.T

    # Pack the three (H,) params into one lane-dense (3, H) f32 block.
    params = jnp.stack([bias, gamma, beta]).astype(jnp.float32)

    x2 = hidden_states.reshape(rows, H)
    r2 = input_tensor.reshape(rows, H)

    # Adapt VMEM budget / default row tile to the chip generation.
    try:
        vmem_cap = int(pltpu.get_tpu_info().vmem_capacity_bytes)
    except Exception:
        vmem_cap = 64 * 1024 * 1024          # conservative (v7x-sized) fallback
    vmem_limit = int(min(vmem_cap * 3 // 4, 100 * 1024 * 1024))
    if row_tile is None:
        row_tile = 512 if vmem_cap >= 100 * 1024 * 1024 else 256

    # Row tile: multiple of the native sublane pack (8 rows f32, 16 rows bf16), capped by
    # the row count. If that would give a single-step grid, halve it so the "parallel"
    # row axis can shard across v7x's two TensorCores.
    itemsize = jnp.dtype(hidden_states.dtype).itemsize
    mult = 8 * max(1, 4 // itemsize)
    tm = max(mult, (min(row_tile, _round_up(rows, mult)) // mult) * mult)
    if pl.cdiv(rows, tm) < 2 and rows >= 2 * mult:
        tm = _round_up(pl.cdiv(rows, 2), mult)
    grid = (pl.cdiv(rows, tm),)   # ragged last block is masked by Pallas; no jnp.pad copies

    kernel = functools.partial(_self_output_kernel, eps=eps)

    def run(single_buffer_params):
        # Constant-index resident operands gain nothing from double-buffering; keep a
        # single copy of the HxH weight in VMEM. Inputs/outputs stay double-buffered.
        pm = pl.Buffered(1) if single_buffer_params else None
        return pl.pallas_call(
            kernel,
            out_shape=jax.ShapeDtypeStruct((rows, H), hidden_states.dtype),
            grid_spec=pltpu.PrefetchScalarGridSpec(
                num_scalar_prefetch=0,
                grid=grid,
                in_specs=[
                    pl.BlockSpec((tm, H), lambda i: (i, 0)),                   # x rows
                    pl.BlockSpec((tm, H), lambda i: (i, 0)),                   # residual rows
                    pl.BlockSpec((H, H), lambda i: (0, 0), pipeline_mode=pm),  # weight [in,out]
                    pl.BlockSpec((3, H), lambda i: (0, 0), pipeline_mode=pm),  # bias/gamma/beta
                ],
                out_specs=pl.BlockSpec((tm, H), lambda i: (i, 0)),
            ),
            compiler_params=pltpu.CompilerParams(
                dimension_semantics=("parallel",),
                vmem_limit_bytes=vmem_limit,
            ),
        )(x2, r2, w_t, params)

    try:
        out = run(True)
    except Exception:
        # pipeline_mode=pl.Buffered(1) not supported on this jax build -> default buffering.
        out = run(False)

    return out.reshape(B, S, H)


def _reference(hidden_states, input_tensor, weight, bias, gamma, beta, eps=1e-12):
    h = jnp.einsum("bsh,oh->bso", hidden_states, weight) + bias
    y = h + input_tensor
    u = jnp.mean(y, axis=-1, keepdims=True)
    s = jnp.mean((y - u) ** 2, axis=-1, keepdims=True)
    x = (y - u) / jnp.sqrt(s + eps)
    return gamma * x + beta


if __name__ == "__main__":
    key = jax.random.PRNGKey(0)
    k1, k2, k3, k4 = jax.random.split(key, 4)

    # Small but lane-dense shapes: H is a multiple of 128 so stores are unmasked.
    B, S, H = 2, 8, 128
    hidden_states = jax.random.normal(k1, (B, S, H), dtype=jnp.float32)
    input_tensor = jax.random.normal(k2, (B, S, H), dtype=jnp.float32)

    # Deterministic parameter init (shapes from nn.Linear(H, H) and LayerNorm(H)).
    bound = 1.0 / (H ** 0.5)
    weight = jax.random.uniform(k3, (H, H), minval=-bound, maxval=bound, dtype=jnp.float32)
    bias = jax.random.uniform(k4, (H,), minval=-bound, maxval=bound, dtype=jnp.float32)
    gamma = jnp.ones((H,), dtype=jnp.float32)
    beta = jnp.zeros((H,), dtype=jnp.float32)

    # f32 path (tolerance covers TPU DEFAULT matmul precision, which may use bf16 passes).
    out = self_output(hidden_states, input_tensor, weight, bias, gamma, beta)
    out = jax.block_until_ready(out)
    ref = _reference(hidden_states, input_tensor, weight, bias, gamma, beta)
    assert out.shape == (B, S, H)
    assert jnp.allclose(out, ref, atol=2e-2, rtol=2e-2), "f32 mismatch vs reference"

    # bf16 fast path: bf16 MXU operands, f32 accumulation + f32 LayerNorm.
    out_bf16 = self_output(
        hidden_states.astype(jnp.bfloat16), input_tensor.astype(jnp.bfloat16),
        weight.astype(jnp.bfloat16), bias, gamma, beta)
    out_bf16 = jax.block_until_ready(out_bf16)
    err = jnp.max(jnp.abs(out_bf16.astype(jnp.float32) - ref))
    assert err < 1e-1, f"bf16 mismatch vs f32 reference: {err}"

    print("KERNEL_OK")
</pallas_src>

<mosaic_0001>
module attributes {stable_mosaic.version = 11 : i64} {
  func.func @_self_output_kernel(%arg0: i32, %arg1: memref<8x128xf32, #tpu.memory_space<vmem>>, %arg2: memref<8x128xf32, #tpu.memory_space<vmem>>, %arg3: memref<128x128xf32, #tpu.memory_space<vmem>>, %arg4: memref<3x128xf32, #tpu.memory_space<vmem>>, %arg5: memref<8x128xf32, #tpu.memory_space<vmem>>) attributes {dimension_semantics = [#tpu.dimension_semantics<parallel>], iteration_bounds = array<i64: 2>, scalar_prefetch = 0 : i64, scratch_operands = 0 : i64, tpu.core_type = #tpu.core_type<tc>, window_params = [{transform_indices = @transform_0, window_bounds = array<i64: 8, 128>}, {transform_indices = @transform_1, window_bounds = array<i64: 8, 128>}, {pipeline_mode = #tpu.pipeline_mode<synchronous>, transform_indices = @transform_2, window_bounds = array<i64: 128, 128>}, {pipeline_mode = #tpu.pipeline_mode<synchronous>, transform_indices = @transform_3, window_bounds = array<i64: 3, 128>}, {transform_indices = @transform_4, window_bounds = array<i64: 8, 128>}]} {
    %c0 = arith.constant 0 : index
    %c0_0 = arith.constant 0 : index
    %0 = vector.load %arg1[%c0, %c0_0] : memref<8x128xf32, #tpu.memory_space<vmem>>, vector<8x128xf32>
    %c0_1 = arith.constant 0 : index
    %c0_2 = arith.constant 0 : index
    %1 = vector.load %arg3[%c0_1, %c0_2] : memref<128x128xf32, #tpu.memory_space<vmem>>, vector<128x128xf32>
    %cst = arith.constant dense<0.000000e+00> : vector<8x128xf32>
    %2 = tpu.matmul %0, %1, %cst {dimension_numbers = #tpu.dot_dimension_numbers<[1], [0], [0], [1], [0, 0, 1, 1], [], []>} : vector<8x128xf32>, vector<128x128xf32>, vector<8x128xf32> -> vector<8x128xf32>
    %c0_3 = arith.constant 0 : index
    %c0_4 = arith.constant 0 : index
    %3 = vector.load %arg4[%c0_3, %c0_4] : memref<3x128xf32, #tpu.memory_space<vmem>>, vector<1x128xf32>
    %c1 = arith.constant 1 : index
    %c0_5 = arith.constant 0 : index
    %4 = vector.load %arg4[%c1, %c0_5] : memref<3x128xf32, #tpu.memory_space<vmem>>, vector<1x128xf32>
    %c2 = arith.constant 2 : index
    %c0_6 = arith.constant 0 : index
    %5 = vector.load %arg4[%c2, %c0_6] : memref<3x128xf32, #tpu.memory_space<vmem>>, vector<1x128xf32>
    %6 = vector.broadcast %3 : vector<1x128xf32> to vector<8x128xf32>
    %7 = arith.addf %2, %6 : vector<8x128xf32>
    %c0_7 = arith.constant 0 : index
    %c0_8 = arith.constant 0 : index
    %8 = vector.load %arg2[%c0_7, %c0_8] : memref<8x128xf32, #tpu.memory_space<vmem>>, vector<8x128xf32>
    %9 = arith.addf %7, %8 : vector<8x128xf32>
    %cst_9 = arith.constant dense<0.000000e+00> : vector<8xf32>
    %10 = vector.multi_reduction <add>, %9, %cst_9 [1] : vector<8x128xf32> to vector<8xf32>
    %11 = vector.shape_cast %10 : vector<8xf32> to vector<8x1xf32>
    %cst_10 = arith.constant 1.280000e+02 : f32
    %12 = vector.broadcast %cst_10 : f32 to vector<8x1xf32>
    %13 = arith.divf %11, %12 : vector<8x1xf32>
    %14 = arith.mulf %9, %9 : vector<8x128xf32>
    %cst_11 = arith.constant dense<0.000000e+00> : vector<8xf32>
    %15 = vector.multi_reduction <add>, %14, %cst_11 [1] : vector<8x128xf32> to vector<8xf32>
    %16 = vector.shape_cast %15 : vector<8xf32> to vector<8x1xf32>
    %cst_12 = arith.constant 1.280000e+02 : f32
    %17 = vector.broadcast %cst_12 : f32 to vector<8x1xf32>
    %18 = arith.divf %16, %17 : vector<8x1xf32>
    %19 = arith.mulf %13, %13 : vector<8x1xf32>
    %20 = arith.subf %18, %19 : vector<8x1xf32>
    %cst_13 = arith.constant 0.000000e+00 : f32
    %21 = vector.broadcast %cst_13 : f32 to vector<8x1xf32>
    %22 = arith.maximumf %20, %21 : vector<8x1xf32>
    %cst_14 = arith.constant 9.99999996E-13 : f32
    %23 = vector.broadcast %cst_14 : f32 to vector<8x1xf32>
    %24 = arith.addf %22, %23 : vector<8x1xf32>
    %25 = math.rsqrt %24 : vector<8x1xf32>
    %26 = vector.broadcast %13 : vector<8x1xf32> to vector<8x128xf32>
    %27 = arith.subf %9, %26 : vector<8x128xf32>
    %28 = vector.broadcast %25 : vector<8x1xf32> to vector<8x128xf32>
    %29 = arith.mulf %27, %28 : vector<8x128xf32>
    %30 = vector.broadcast %4 : vector<1x128xf32> to vector<8x128xf32>
    %31 = arith.mulf %29, %30 : vector<8x128xf32>
    %32 = vector.broadcast %5 : vector<1x128xf32> to vector<8x128xf32>
    %33 = arith.addf %31, %32 : vector<8x128xf32>
    %c0_15 = arith.constant 0 : index
    %c0_16 = arith.constant 0 : index
    %34 = vector.load %arg5[%c0_15, %c0_16] : memref<8x128xf32, #tpu.memory_space<vmem>>, vector<8x128xf32>
    tpu.vector_store %arg5[%c0_15, %c0_16], %33 {strides = array<i32>} : memref<8x128xf32, #tpu.memory_space<vmem>>, vector<8x128xf32>,
    return
  }
  func.func @transform_0(%arg0: i32) -> (i32, i32) {
    %c0_i32 = arith.constant 0 : i32
    %c0_i32_0 = arith.constant 0 : i32
    return %arg0, %c0_i32 : i32, i32
  }
  func.func @transform_1(%arg0: i32) -> (i32, i32) {
    %c0_i32 = arith.constant 0 : i32
    %c0_i32_0 = arith.constant 0 : i32
    return %arg0, %c0_i32 : i32, i32
  }
  func.func @transform_2(%arg0: i32) -> (i32, i32) {
    %c0_i32 = arith.constant 0 : i32
    %c0_i32_0 = arith.constant 0 : i32
    %c0_i32_1 = arith.constant 0 : i32
    return %c0_i32, %c0_i32_0 : i32, i32
  }
  func.func @transform_3(%arg0: i32) -> (i32, i32) {
    %c0_i32 = arith.constant 0 : i32
    %c0_i32_0 = arith.constant 0 : i32
    %c0_i32_1 = arith.constant 0 : i32
    return %c0_i32, %c0_i32_0 : i32, i32
  }
  func.func @transform_4(%arg0: i32) -> (i32, i32) {
    %c0_i32 = arith.constant 0 : i32
    %c0_i32_0 = arith.constant 0 : i32
    return %arg0, %c0_i32 : i32, i32
  }
}

module attributes {stable_mosaic.version = 11 : i64} {
  func.func @_self_output_kernel(%arg0: i32, %arg1: memref<8x128xf32, #tpu.memory_space<vmem>>, %arg2: memref<8x128xf32, #tpu.memory_space<vmem>>, %arg3: memref<128x128xf32, #tpu.memory_space<vmem>>, %arg4: memref<3x128xf32, #tpu.memory_space<vmem>>, %arg5: memref<8x128xf32, #tpu.memory_space<vmem>>) attributes {dimension_semantics = [#tpu.dimension_semantics<parallel>], iteration_bounds = array<i64: 2>, scalar_prefetch = 0 : i64, scratch_operands = 0 : i64, tpu.core_type = #tpu.core_type<tc>, window_params = [{transform_indices = @transform_0, window_bounds = array<i64: 8, 128>}, {transform_indices = @transform_1, window_bounds = array<i64: 8, 128>}, {pipeline_mode = #tpu.pipeline_mode<synchronous>, transform_indices = @transform_2, window_bounds = array<i64: 128, 128>}, {pipeline_mode = #tpu.pipeline_mode<synchronous>, transform_indices = @transform_3, window_bounds = array<i64: 3, 128>}, {transform_indices = @transform_4, window_bounds = array<i64: 8, 128>}]} {
    %c0 = arith.constant 0 : index
    %c0_0 = arith.constant 0 : index
    %0 = vector.load %arg1[%c0, %c0_0] : memref<8x128xf32, #tpu.memory_space<vmem>>, vector<8x128xf32>
    %c0_1 = arith.constant 0 : index
    %c0_2 = arith.constant 0 : index
    %1 = vector.load %arg3[%c0_1, %c0_2] : memref<128x128xf32, #tpu.memory_space<vmem>>, vector<128x128xf32>
    %cst = arith.constant dense<0.000000e+00> : vector<8x128xf32>
    %2 = tpu.matmul %0, %1, %cst {dimension_numbers = #tpu.dot_dimension_numbers<[1], [0], [0], [1], [0, 0, 1, 1], [], []>} : vector<8x128xf32>, vector<128x128xf32>, vector<8x128xf32> -> vector<8x128xf32>
    %c0_3 = arith.constant 0 : index
    %c0_4 = arith.constant 0 : index
    %3 = vector.load %arg4[%c0_3, %c0_4] : memref<3x128xf32, #tpu.memory_space<vmem>>, vector<1x128xf32>
    %c1 = arith.constant 1 : index
    %c0_5 = arith.constant 0 : index
    %4 = vector.load %arg4[%c1, %c0_5] : memref<3x128xf32, #tpu.memory_space<vmem>>, vector<1x128xf32>
    %c2 = arith.constant 2 : index
    %c0_6 = arith.constant 0 : index
    %5 = vector.load %arg4[%c2, %c0_6] : memref<3x128xf32, #tpu.memory_space<vmem>>, vector<1x128xf32>
    %6 = vector.broadcast %3 : vector<1x128xf32> to vector<8x128xf32>
    %7 = arith.addf %2, %6 : vector<8x128xf32>
    %c0_7 = arith.constant 0 : index
    %c0_8 = arith.constant 0 : index
    %8 = vector.load %arg2[%c0_7, %c0_8] : memref<8x128xf32, #tpu.memory_space<vmem>>, vector<8x128xf32>
    %9 = arith.addf %7, %8 : vector<8x128xf32>
    %cst_9 = arith.constant dense<0.000000e+00> : vector<8xf32>
    %10 = vector.multi_reduction <add>, %9, %cst_9 [1] : vector<8x128xf32> to vector<8xf32>
    %11 = vector.shape_cast %10 : vector<8xf32> to vector<8x1xf32>
    %cst_10 = arith.constant 1.280000e+02 : f32
    %12 = vector.broadcast %cst_10 : f32 to vector<8x1xf32>
    %13 = arith.divf %11, %12 : vector<8x1xf32>
    %14 = arith.mulf %9, %9 : vector<8x128xf32>
    %cst_11 = arith.constant dense<0.000000e+00> : vector<8xf32>
    %15 = vector.multi_reduction <add>, %14, %cst_11 [1] : vector<8x128xf32> to vector<8xf32>
    %16 = vector.shape_cast %15 : vector<8xf32> to vector<8x1xf32>
    %cst_12 = arith.constant 1.280000e+02 : f32
    %17 = vector.broadcast %cst_12 : f32 to vector<8x1xf32>
    %18 = arith.divf %16, %17 : vector<8x1xf32>
    %19 = arith.mulf %13, %13 : vector<8x1xf32>
    %20 = arith.subf %18, %19 : vector<8x1xf32>
    %cst_13 = arith.constant 0.000000e+00 : f32
    %21 = vector.broadcast %cst_13 : f32 to vector<8x1xf32>
    %22 = arith.maximumf %20, %21 : vector<8x1xf32>
    %cst_14 = arith.constant 9.99999996E-13 : f32
    %23 = vector.broadcast %cst_14 : f32 to vector<8x1xf32>
    %24 = arith.addf %22, %23 : vector<8x1xf32>
    %25 = math.rsqrt %24 : vector<8x1xf32>
    %26 = vector.broadcast %13 : vector<8x1xf32> to vector<8x128xf32>
    %27 = arith.subf %9, %26 : vector<8x128xf32>
    %28 = vector.broadcast %25 : vector<8x1xf32> to vector<8x128xf32>
    %29 = arith.mulf %27, %28 : vector<8x128xf32>
    %30 = vector.broadcast %4 : vector<1x128xf32> to vector<8x128xf32>
    %31 = arith.mulf %29, %30 : vector<8x128xf32>
    %32 = vector.broadcast %5 : vector<1x128xf32> to vector<8x128xf32>
    %33 = arith.addf %31, %32 : vector<8x128xf32>
    %c0_15 = arith.constant 0 : index
    %c0_16 = arith.constant 0 : index
    %34 = vector.load %arg5[%c0_15, %c0_16] : memref<8x128xf32, #tpu.memory_space<vmem>>, vector<8x128xf32>
    tpu.vector_store %arg5[%c0_15, %c0_16], %33 {strides = array<i32>} : memref<8x128xf32, #tpu.memory_space<vmem>>, vector<8x128xf32>,
    return
  }
  func.func @transform_0(%arg0: i32) -> (i32, i32) {
    %c0_i32 = arith.constant 0 : i32
    %c0_i32_0 = arith.constant 0 : i32
    return %arg0, %c0_i32 : i32, i32
  }
  func.func @transform_1(%arg0: i32) -> (i32, i32) {
    %c0_i32 = arith.constant 0 : i32
    %c0_i32_0 = arith.constant 0 : i32
    return %arg0, %c0_i32 : i32, i32
  }
  func.func @transform_2(%arg0: i32) -> (i32, i32) {
    %c0_i32 = arith.constant 0 : i32
    %c0_i32_0 = arith.constant 0 : i32
    %c0_i32_1 = arith.constant 0 : i32
    return %c0_i32, %c0_i32_0 : i32, i32
  }
  func.func @transform_3(%arg0: i32) -> (i32, i32) {
    %c0_i32 = arith.constant 0 : i32
    %c0_i32_0 = arith.constant 0 : i32
    %c0_i32_1 = arith.constant 0 : i32
    return %c0_i32, %c0_i32_0 : i32, i32
  }
  func.func @transform_4(%arg0: i32) -> (i32, i32) {
    %c0_i32 = arith.constant 0 : i32
    %c0_i32_0 = arith.constant 0 : i32
    return %arg0, %c0_i32 : i32, i32
  }
}

</mosaic_0001>

<bundles_post_ra>
// kernel: tpu_custom_call.1
= control target key start
LH: loop header
LB: loop body
LE: loop exit
PB: predicated region body
PF: predicated region fallthrough
CT: control target
= control target key end

     0   :  { %s1042_s0 = inlined_call_operand.hbm [shape: f32[16,128], index: 0, kind: input, shape index: {}]   ;;  %s1043_s1 = inlined_call_operand.hbm [shape: f32[16,128], index: 1, kind: input, shape index: {}]   ;;  %s1044_s2 = inlined_call_operand.hbm [shape: f32[128,128], index: 2, kind: input, shape index: {}]   ;;  %s1045_s3 = inlined_call_operand.vmem [shape: f32[3,128], index: 3, kind: input, shape index: {}]   ;;  %s1046_s4 = inlined_call_operand.hbm [shape: f32[16,128], index: 4, kind: output, shape index: {}]  }
   0x1   :  { %1051 = sst [smem:[#allocation13_spill]] %s1044_s2 }
   0x2   :  { %9 = vsyncpa [#allocation3], 0 }
   0x3   :  { %11 = vsyncpa [#allocation3 + $0x1], 0 }
   0x4   :  { %12 = vsyncpa [#allocation6], 0 }
   0x5   :  { %14 = vsyncpa [#allocation6 + $0x1], 0 }
   0x6   :  { %15 = vsyncpa [#allocation4], 0 }
   0x7   :  { %17 = vsyncpa [#allocation4 + $0x1], 0  ;;  %s831_s15 = smov 0   ;;  %s833_s16 = smov 0  }
   0x8   :  { %s835_s17 = smov 0   ;;  %s837_s18 = smov 0  }
   0x9 LB: > { %s852_s19 = sadd.s32 4294967295, %s796_s18   ;;  %s502_s20 = sadd.s32 4294967294, %s796_s18   ;;  %s796_s18 = sphi %s837_s18, %s1070_s18   ;;  %s792_s17 = sphi %s835_s17, %s1069_s17   ;;  %s788_s16 = sphi %s833_s16, %s1068_s16   ;;  %s784_s15 = sphi %s831_s15, %s1067_s15  }
   0xa   : > { %p43_p0 = scmp.ne.s32.totalorder %s788_s16, %s784_s15  ;;  %p1047_p1 = scmp.eq.s32.totalorder %s852_s19, 0 }
   0xb   : > { %p141_p3 = scmp.eq.s32.totalorder %s502_s20, 1  ;;  %p503_p5 = scmp.ge.s32.totalorder %s796_s18, 1 }
   0xc   : > { %p861_p4 = por %p1047_p1, %p43_p0  ;;  %p148_p7 = scmp.lt.s32.totalorder %s796_s18, 3 }
   0xd   : > { %p866_p6 = por %p141_p3, %p43_p0  ;;  %s798_s24 = smov [#allocation7]  }
   0xe   : > { %s1052_s21 = scalar_select %p861_p4, 1, 0 }
   0xf   : > { %s1053_s22 = scalar_select %p866_p6, 1, 0 }
  0x10   : > { %p871_p8 = pnand %p503_p5, %p148_p7  ;;  %s160_s25 = sshll.u32 %s798_s24, 4  ;;  %s161_s25 = int_to_ptr.vmem [resolvable:$true] %s160_s25 }
  0x11   : > { %s885_s27 = sadd.s32 1, %s796_s18   ;;  %s30_s28 = sadd.s32 1, %s792_s17 }
  0x12   : > { %s1054_s23 = scalar_select %p871_p8, 1, 0 }
  0x13   : > { %p584_p9 = pneg %p871_p8  ;;  %s27_s29 = ssub.s32 %s796_s18, %s885_s27 }
  0x14   : > { %s653_s30 = scalar_lea.vmem %s161_s25, 2048  ;;  %p661_p5 = scmp.lt.s32.totalorder %s161_s25, %s161_s25 }
  0x15   : > { %p880_p11 = pnand %p584_p9, %p1047_p1  ;;  %p654_p13 = scmp.ne.s32.totalorder %s161_s25, %s653_s30 }
  0x16   : > { %p662_p7 = scmp.lt.s32.totalorder %s653_s30, %s653_s30 }
  0x17   : > { %p644_p12 = pneg %p880_p11 }
  0x18   : > { %p663_p10 = por %p662_p7, %p661_p5 }
  0x19   : > { %p656_p0 = pnand %p654_p13, %p644_p12 }
  0x1b   : > { %p657_p3 = pneg %p656_p0 }
  0x1d   : > { %p664_p2 = pnand %p663_p10, %p657_p3 }
  0x1f   : > { %667 = shalt.err (!%p664_p2)
}
  0x20   : > { %s799_s5 = smov 128   ;;  %s800_s6 = smov 8  }
  0x21   : > { %s1056_s2 = sld [smem:[#allocation13_spill]]  ;;  %p28_p9 = scmp.eq.s32.totalorder %s27_s29, 0 }
  0x22   : > { %p37_p12 = scmp.ne.s32.totalorder %s792_s17, %s788_s16  ;;  %p38_p10 = scmp.eq.s32.totalorder %s796_s18, 0 }
  0x23   : > { %p600_p2 = scmp.lt.s32.totalorder %s796_s18, 2  ;;  %p1057_p0 = scmp.eq.s32.totalorder %s852_s19, 1 }
  0x24   : > { %s902_s9 = scalar_select %p28_p9, %s792_s17, %s30_s28  }
  0x25   : > { %p39_p13 = por %p38_p10, %p37_p12  ;;  %p906_p3 = por %p1057_p0, %p37_p12 }
  0x26   : > { %s177_s11 = sand.u32 1, %s792_s17   ;;  %s507_s12 = sshll.u32 %s796_s18, 7 }
  0x27   : > { %587 = dma.hbm_to_vmem [thread:$0]  (!%p880_p11), %s1056_s2, 2048, %s161_s25, [#allocation6], %s799_s5, %s799_s5, %s800_s6  }
  0x28   : > { %s1058_s10 = scalar_select %p906_p3, 1, 0 }
  0x29   : > { %s912_s13 = sshll.u32 %s177_s11, 3  ;;  %s917_s24 = scalar_lea.hbm %s1042_s0, %s507_s12 }
  0x2a   : > { %s181_s25 = scalar_lea.vmem [#allocation2], %s912_s13  ;;  %p920_p11 = pnand %p600_p2, %p39_p13 }
  0x2b   : > { %s188_s26 = sshll.u32 %s181_s25, 4  ;;  %s927_s5 = scalar_lea.hbm %s1043_s1, %s507_s12  ;;  %s189_s26 = int_to_ptr.vmem [resolvable:$true] %s188_s26 }
  0x2c   : > { %s178_s6 = scalar_lea.sflag [#allocation3], %s177_s11  ;;  %s668_s7 = scalar_lea.hbm %s917_s24, 128 }
  0x2d   : > { %p669_p5 = scmp.ne.s32.totalorder %s917_s24, %s668_s7  ;;  %p670_p7 = pneg %p920_p11 }
  0x2e   : > { %s673_s20 = scalar_lea.hbm %s1042_s0, 256  ;;  %p674_p10 = scmp.lt.s32.totalorder %s917_s24, %s1042_s0 }
  0x2f   : > { %p671_p9 = pnand %p670_p7, %p669_p5  ;;  %p675_p2 = scmp.lt.s32.totalorder %s673_s20, %s668_s7 }
  0x31   : > { %p672_p12 = pneg %p671_p9  ;;  %p676_p13 = por %p675_p2, %p674_p10 }
  0x33   : > { %p677_p0 = pnand %p676_p13, %p672_p12 }
  0x35   : > { %680 = shalt.err (!%p677_p0)
}
  0x36   : > { %s681_s11 = scalar_lea.vmem %s189_s26, 128  ;;  %s801_s12 = smov [#allocation2]  }
  0x37   : > { %p682_p1 = scmp.ne.s32.totalorder %s189_s26, %s681_s11  ;;  %s686_s29 = sshll.u32 %s801_s12, 4  ;;  %s687_s29 = int_to_ptr.vmem [resolvable:$false] %s686_s29 }
  0x38   : > { %s688_s30 = scalar_lea.vmem %s687_s29, 256  ;;  %p689_p9 = scmp.lt.s32.totalorder %s189_s26, %s687_s29 }
  0x39   : > { %p684_p6 = pnand %p682_p1, %p670_p7  ;;  %p690_p3 = scmp.lt.s32.totalorder %s688_s30, %s681_s11 }
  0x3b   : > { %p685_p5 = pneg %p684_p6  ;;  %p691_p4 = por %p690_p3, %p689_p9 }
  0x3d   : > { %p692_p8 = pnand %p691_p4, %p685_p5 }
  0x3f   : > { %695 = shalt.err (!%p692_p8)
}
  0x40   : > { %591 = dma.hbm_to_vmem [thread:$0]  (!%p920_p11), %s917_s24, 128, %s189_s26, %s178_s6  }
  0x41   : > { %s195_s2 = sand.u32 1, %s796_s18   ;;  %s199_s7 = scalar_lea.vmem [#allocation5], %s912_s13 }
  0x42   : > { %s206_s8 = sshll.u32 %s199_s7, 4  ;;  %s196_s14 = scalar_lea.sflag [#allocation6], %s195_s2  ;;  %s207_s8 = int_to_ptr.vmem [resolvable:$true] %s206_s8 }
  0x43   : > { %s696_s20 = scalar_lea.hbm %s927_s5, 128  ;;  %s701_s12 = scalar_lea.hbm %s1043_s1, 256 }
  0x44   : > { %p697_p1 = scmp.ne.s32.totalorder %s927_s5, %s696_s20  ;;  %p702_p8 = scmp.lt.s32.totalorder %s927_s5, %s1043_s1 }
  0x45   : > { %p703_p3 = scmp.lt.s32.totalorder %s701_s12, %s696_s20 }
  0x46   : > { %p699_p4 = pnand %p697_p1, %p670_p7 }
  0x47   : > { %p704_p12 = por %p703_p3, %p702_p8 }
  0x48   : > { %p700_p6 = pneg %p699_p4 }
  0x4a   : > { %p705_p10 = pnand %p704_p12, %p700_p6 }
  0x4c   : > { %708 = shalt.err (!%p705_p10)
}
  0x4d   : > { %s709_s13 = scalar_lea.vmem %s207_s8, 128  ;;  %s802_s24 = smov [#allocation5]  }
  0x4e   : > { %p710_p2 = scmp.ne.s32.totalorder %s207_s8, %s709_s13  ;;  %s714_s26 = sshll.u32 %s802_s24, 4  ;;  %s715_s26 = int_to_ptr.vmem [resolvable:$false] %s714_s26 }
  0x4f   : > { %s716_s6 = scalar_lea.vmem %s715_s26, 256  ;;  %p717_p5 = scmp.lt.s32.totalorder %s207_s8, %s715_s26 }
  0x50   : > { %p712_p13 = pnand %p710_p2, %p670_p7  ;;  %p718_p9 = scmp.lt.s32.totalorder %s716_s6, %s709_s13 }
  0x52   : > { %p713_p0 = pneg %p712_p13  ;;  %p719_p1 = por %p718_p9, %p717_p5 }
  0x54   : > { %p720_p4 = pnand %p719_p1, %p713_p0 }
  0x56   : > { %723 = shalt.err (!%p720_p4)
}
  0x57   : > { %594 = dma.hbm_to_vmem [thread:$0]  (!%p920_p11), %s927_s5, 128, %s207_s8, %s196_s14  }
  0x58   : > { %p1060_p6 = scmp.ne.s32.totalorder %s1054_s23, 0 }
  0x59   : > { %s972_s2 = sand.u32 (!%p1060_p6), 1, %s788_s16   ;;  %p1061_p7 = scmp.ne.s32.totalorder (!%p1060_p6), %s1052_s21, 0 }
  0x5a   : > { %215 = sbr.rel (%p1060_p6) target bundleno = 515 (0x203), region = 36  ;;  %s975_s7 = sshll.u32 (!%p1060_p6), %s972_s2, 3 }
  0x5b   : > { %s218_s20 = scalar_lea.sflag (!%p1060_p6), [#allocation3], %s972_s2  ;;  %s221_s25 = scalar_lea.vmem (!%p1060_p6), [#allocation2], %s975_s7 }
  0x5f   : > { %767 = dma.done.wait (%p1061_p7), %s218_s20, 128  }
  0x60   : > { %769 = vsyncadd (%p1061_p7), %s218_s20, 4294967168  ;;  %s226_s23 = sand.u32 1, %s852_s19   ;;  %s230_s5 = scalar_lea.vmem [#allocation5], %s975_s7 }
  0x61   : > { %s227_s28 = scalar_lea.sflag [#allocation6], %s226_s23 }
  0x62   : > { %771 = dma.done.wait (%p1061_p7), %s227_s28, 128  }
  0x63   : > { %773 = vsyncadd (%p1061_p7), %s227_s28, 4294967168  ;;  %p1062_p11 = scmp.eq.s32.totalorder %s852_s19, 0 }
  0x65   : > { %775 = dma.done.wait (%p1062_p11), [#allocation6], 2048   ;;  %p1063_p8 = pmov %p1062_p11 }
  0x66   : > { %v803_v0 = vmov 0.0   ;;  %vm804_vm0 = vmmov 0   ;;  %v280_v1 = vld [vmem:[#allocation7 + $0x78] sm:$0xff]  ;;  %v279_v2 = vld [vmem:[#allocation7 + $0x70] sm:$0xff]  ;;  %v278_v3 = vld [vmem:[#allocation7 + $0x68] sm:$0xff]  ;;  %s519_s30 = sshll.u32 %s852_s19, 7 }
  0x67   : > { %777 = vsyncadd (%p1063_p8), [#allocation6], 4294965248  ;;  %539 = vmatprep.subr.mxu0 %v803_v0  ;;  %571 = vmatprep.mubr.msk.f32.mxu0 %vm804_vm0, %v803_v0  ;;  %v277_v4 = vld [vmem:[#allocation7 + $0x60] sm:$0xff]  ;;  %v276_v5 = vld [vmem:[#allocation7 + $0x58] sm:$0xff]  ;;  %s263_s13 = scalar_lea.vmem [#allocation8], %s975_s7  ;;  %s398_s20 = scalar_lea.hbm %s1046_s4, %s519_s30 }
  0x68   : > { %540 = vmatpush3.msra.mxu0 %v280_v1  ;;  %v275_v6 = vld [vmem:[#allocation7 + $0x50] sm:$0xff]  ;;  %v274_v7 = vld [vmem:[#allocation7 + $0x48] sm:$0xff]  ;;  %v273_v8 = vld [vmem:[#allocation7 + $0x40] sm:$0xff]  ;;  %s400_s24 = sshll.u32 %s263_s13, 4  ;;  %p1064_p12 = scmp.ne.s32.totalorder %s1058_s10, 0  ;;  %s401_s24 = int_to_ptr.vmem [resolvable:$true] %s400_s24 }
  0x69   : > { %541 = vmatprep.subr.mxu0 %v803_v0  ;;  %v272_v9 = vld [vmem:[#allocation7 + $0x38] sm:$0xff]  ;;  %v271_v10 = vld [vmem:[#allocation7 + $0x30] sm:$0xff]  ;;  %v270_v11 = vld [vmem:[#allocation7 + $0x28] sm:$0xff]  ;;  %s724_s23 = scalar_lea.vmem %s401_s24, 128  ;;  %s805_s28 = smov [#allocation8]  }
  0x6a   : > { %542 = vmatpush3.msra.mxu0 %v279_v2  ;;  %v269_v12 = vld [vmem:[#allocation7 + $0x20] sm:$0xff]  ;;  %v268_v13 = vld [vmem:[#allocation7 + $0x18] sm:$0xff]  ;;  %v267_v14 = vld [vmem:[#allocation7 + $0x10] sm:$0xff]  ;;  %p725_p3 = scmp.ne.s32.totalorder %s401_s24, %s724_s23 }
  0x6b   : > { %543 = vmatprep.subr.mxu0 %v803_v0  ;;  %v266_v15 = vld [vmem:[#allocation7 + $0x8] sm:$0xff]  ;;  %v265_v16 = vld [vmem:[#allocation7] sm:$0xff]  ;;  %v358_v20 = vld [vmem:[%s230_s5] sm:$0xff]  ;;  %s728_s5 = sshll.u32 %s805_s28, 4  ;;  %s729_s5 = int_to_ptr.vmem [resolvable:$false] %s728_s5 }
  0x6c   : > { %544 = vmatpush3.msra.mxu0 %v278_v3  ;;  %v264_v17 = vld [vmem:[%s221_s25] sm:$0xff]  ;;  %s387_s25 = scalar_lea.sflag [#allocation4], %s972_s2  ;;  %p726_p10 = pnand %p725_p3, %p1064_p12 }
  0x6d   : > { %545 = vmatprep.subr.mxu0 %v803_v0  ;;  %v515_v18 = vld [vmem:[%s1045_s3] ss:$0 sm:$0xff]  ;;  %v516_v35 = vld [vmem:[%s1045_s3 + $0x1] ss:$0 sm:$0xff]  ;;  %v517_v37 = vld [vmem:[%s1045_s3 + $0x2] ss:$0 sm:$0xff]  ;;  %p731_p13 = scmp.lt.s32.totalorder %s401_s24, %s729_s5 }
  0x6e   : > { %546 = vmatpush3.msra.mxu0 %v277_v4  ;;  %p727_p2 = pneg %p726_p10  ;;  %s730_s19 = scalar_lea.vmem %s729_s5, 256 }
  0x6f   : > { %547 = vmatprep.subr.mxu0 %v803_v0  ;;  %p732_p0 = scmp.lt.s32.totalorder %s730_s19, %s724_s23 }
  0x70   : > { %548 = vmatpush3.msra.mxu0 %v276_v5 }
  0x71   : > { %549 = vmatprep.subr.mxu0 %v803_v0  ;;  %p733_p5 = por %p732_p0, %p731_p13 }
  0x72   : > { %550 = vmatpush3.msra.mxu0 %v275_v6 }
  0x73   : > { %551 = vmatprep.subr.mxu0 %v803_v0  ;;  %p734_p9 = pnand %p733_p5, %p727_p2 }
  0x74   : > { %552 = vmatpush3.msra.mxu0 %v274_v7 }
  0x75   : > { %553 = vmatprep.subr.mxu0 %v803_v0 }
  0x76   : > { %554 = vmatpush3.msra.mxu0 %v273_v8 }
  0x77   : > { %555 = vmatprep.subr.mxu0 %v803_v0 }
  0x78   : > { %556 = vmatpush3.msra.mxu0 %v272_v9 }
  0x79   : > { %557 = vmatprep.subr.mxu0 %v803_v0 }
  0x7a   : > { %558 = vmatpush3.msra.mxu0 %v271_v10 }
  0x7b   : > { %559 = vmatprep.subr.mxu0 %v803_v0 }
  0x7c   : > { %560 = vmatpush3.msra.mxu0 %v270_v11 }
  0x7d   : > { %561 = vmatprep.subr.mxu0 %v803_v0 }
  0x7e   : > { %562 = vmatpush3.msra.mxu0 %v269_v12 }
  0x7f   : > { %563 = vmatprep.subr.mxu0 %v803_v0 }
  0x80   : > { %564 = vmatpush3.msra.mxu0 %v268_v13 }
  0x81   : > { %565 = vmatprep.subr.mxu0 %v803_v0 }
  0x82   : > { %566 = vmatpush3.msra.mxu0 %v267_v14 }
  0x83   : > { %567 = vmatprep.subr.mxu0 %v803_v0 }
  0x84   : > { %568 = vmatpush3.msra.mxu0 %v266_v15 }
  0x85   : > { %569 = vmatprep.subr.mxu0 %v803_v0 }
  0x86   : > { %570 = vmatpush3.msra.mxu0 %v265_v16 }
  0x87   : > { %572 = vmatmul.mubr.f32.vlgmr.msra.gmra.mxu0 %v264_v17 }
 0x147   : > { %v354_v19 = vpop.f32.mrf.mxu0 }
 0x148   : > { %v355_v21 = vadd.f32 %v515_v18, %v354_v19 }
 0x149   : > { %v573_v22 = vpop.f32.mrf.mxu0 }
 0x14a   : > { %v359_v23 = vadd.f32 %v358_v20, %v355_v21 }
 0x14c   : > { %360 = vadd.xlane.f32.xlu0 %v359_v23  ;;  %v364_v24 = vmul.f32 %v359_v23, %v359_v23 }
 0x150   : > { %365 = vadd.xlane.f32.xlu0 %v364_v24 }
 0x1d5   : > { %v361_v25 = vpop.xlane.xlu0 %360 }
 0x1d6   : > { %v363_v26 = vmul.f32 0.0078125, %v361_v25 }
 0x1d8   : > { %v368_v28 = vmul.f32 %v363_v26, %v363_v26  ;;  %v373_v33 = vsub.f32 %v359_v23, %v363_v26 }
 0x1d9   : > { %v366_v27 = vpop.xlane.xlu0 %365 }
 0x1da   : > { %v367_v29 = vmul.f32 0.0078125, %v366_v27 }
 0x1dc   : > { %v369_v30 = vsub.f32 %v367_v29, %v368_v28 }
 0x1de   : > { %v370_v31 = vmax.f32 %v369_v30, 0.0 }
 0x1e0   : > { %v371_v32 = vadd.f32 1e-12, %v370_v31 }
 0x1e2   : > { %640 = vrsqrt.f32 %v371_v32 }
 0x1ef   : > { %v641_v34 = vpop.eup %640 }
 0x1f0   : > { %v374_v36 = vmul.f32 %v641_v34, %v373_v33 }
 0x1f2   : > { %v379_v38 = vmul.f32 %v516_v35, %v374_v36 }
 0x1f4   : > { %v384_v39 = vadd.f32 %v517_v37, %v379_v38 }
 0x1f6   : > { %385 = vst [vmem:[%s263_s13] sm:$0xff] %v384_v39 }
 0x1f7   : > { %737 = shalt.err (!%p734_p9)
}
 0x1f8   : > { %s738_s7 = scalar_lea.hbm %s398_s20, 128  ;;  %s742_s8 = scalar_lea.hbm %s1046_s4, 256 }
 0x1f9   : > { %p739_p1 = scmp.ne.s32.totalorder %s398_s20, %s738_s7  ;;  %p743_p7 = scmp.lt.s32.totalorder %s398_s20, %s1046_s4 }
 0x1fa   : > { %p744_p11 = scmp.lt.s32.totalorder %s742_s8, %s738_s7 }
 0x1fb   : > { %p740_p4 = pnand %p739_p1, %p1064_p12 }
 0x1fc   : > { %p745_p8 = por %p744_p11, %p743_p7 }
 0x1fd   : > { %p741_p6 = pneg %p740_p4 }
 0x1ff   : > { %p746_p3 = pnand %p745_p8, %p741_p6 }
 0x201   : > { %749 = shalt.err (!%p746_p3)
}
 0x202   : > { %582 = dma.vmem_to_hbm [thread:$0]  (%p1064_p12), %s401_s24, 128, %s398_s20, %s387_s25  }
 0x203 PF: > { %s412_s12 = sand.u32 1, %s784_s15   ;;  %p1065_p10 = scmp.ne.s32.totalorder %s1053_s22, 0 }
 0x204   : > { %p1066_p2 = scmp.ge.s32.totalorder %s796_s18, 2  ;;  %s413_s29 = scalar_lea.sflag [#allocation4], %s412_s12 }
 0x206   : > { %p596_p13 = pnand %p1066_p2, %p1065_p10 }
 0x208   : > { %p597_p0 = pneg %p596_p13 }
 0x20a   : > { %779 = dma.done.wait (%p597_p0), %s413_s29, 128  }
 0x20b   : > { %781 = vsyncadd (%p597_p0), %s413_s29, 4294967168  ;;  %p20_p5 = scmp.ge.s32.totalorder %s885_s27, 4   ;;  %s1067_s15 = smov %s788_s16 }
 0x20c   : > { %s1068_s16 = smov %s792_s17  ;;  %s1069_s17 = smov %s902_s9 }
 0x20d   : > { %s1070_s18 = smov %s885_s27  ;;  %22 = sbr.rel (!%p20_p5) target bundleno = 9 (0x9), region = 98 }
 0x212   :  { %418 = vsyncpa [#allocation3], 1 }
 0x213   :  { %420 = vsyncpa [#allocation3 + $0x1], 1 }
 0x214   :  { %421 = vsyncpa [#allocation6], 1 }
 0x215   :  { %423 = vsyncpa [#allocation6 + $0x1], 1 }
 0x216   :  { %424 = vsyncpa [#allocation4], 1 }
 0x217   :  { %426 = vsyncpa [#allocation4 + $0x1], 1 }

// kernel: tpu_custom_call.1
= control target key start
LH: loop header
LB: loop body
LE: loop exit
PB: predicated region body
PF: predicated region fallthrough
CT: control target
= control target key end

     0   :  { %s1042_s0 = inlined_call_operand.hbm [shape: f32[16,128], index: 0, kind: input, shape index: {}]   ;;  %s1043_s1 = inlined_call_operand.hbm [shape: f32[16,128], index: 1, kind: input, shape index: {}]   ;;  %s1044_s2 = inlined_call_operand.hbm [shape: f32[128,128], index: 2, kind: input, shape index: {}]   ;;  %s1045_s3 = inlined_call_operand.vmem [shape: f32[3,128], index: 3, kind: input, shape index: {}]   ;;  %s1046_s4 = inlined_call_operand.hbm [shape: f32[16,128], index: 4, kind: output, shape index: {}]  }
   0x1   :  { %1051 = sst [smem:[#allocation13_spill]] %s1044_s2 }
   0x2   :  { %9 = vsyncpa [#allocation3], 0 }
   0x3   :  { %11 = vsyncpa [#allocation3 + $0x1], 0 }
   0x4   :  { %12 = vsyncpa [#allocation6], 0 }
   0x5   :  { %14 = vsyncpa [#allocation6 + $0x1], 0 }
   0x6   :  { %15 = vsyncpa [#allocation4], 0 }
   0x7   :  { %17 = vsyncpa [#allocation4 + $0x1], 0  ;;  %s831_s15 = smov 0   ;;  %s833_s16 = smov 0  }
   0x8   :  { %s835_s17 = smov 0   ;;  %s837_s18 = smov 0  }
   0x9 LB: > { %s852_s19 = sadd.s32 4294967295, %s796_s18   ;;  %s502_s20 = sadd.s32 4294967294, %s796_s18   ;;  %s796_s18 = sphi %s837_s18, %s1070_s18   ;;  %s792_s17 = sphi %s835_s17, %s1069_s17   ;;  %s788_s16 = sphi %s833_s16, %s1068_s16   ;;  %s784_s15 = sphi %s831_s15, %s1067_s15  }
   0xa   : > { %p43_p0 = scmp.ne.s32.totalorder %s788_s16, %s784_s15  ;;  %p1047_p1 = scmp.eq.s32.totalorder %s852_s19, 0 }
   0xb   : > { %p141_p3 = scmp.eq.s32.totalorder %s502_s20, 1  ;;  %p503_p5 = scmp.ge.s32.totalorder %s796_s18, 1 }
   0xc   : > { %p861_p4 = por %p1047_p1, %p43_p0  ;;  %p148_p7 = scmp.lt.s32.totalorder %s796_s18, 3 }
   0xd   : > { %p866_p6 = por %p141_p3, %p43_p0  ;;  %s798_s24 = smov [#allocation7]  }
   0xe   : > { %s1052_s21 = scalar_select %p861_p4, 1, 0 }
   0xf   : > { %s1053_s22 = scalar_select %p866_p6, 1, 0 }
  0x10   : > { %p871_p8 = pnand %p503_p5, %p148_p7  ;;  %s160_s25 = sshll.u32 %s798_s24, 4  ;;  %s161_s25 = int_to_ptr.vmem [resolvable:$true] %s160_s25 }
  0x11   : > { %s885_s27 = sadd.s32 1, %s796_s18   ;;  %s30_s28 = sadd.s32 1, %s792_s17 }
  0x12   : > { %s1054_s23 = scalar_select %p871_p8, 1, 0 }
  0x13   : > { %p584_p9 = pneg %p871_p8  ;;  %s27_s29 = ssub.s32 %s796_s18, %s885_s27 }
  0x14   : > { %s653_s30 = scalar_lea.vmem %s161_s25, 2048  ;;  %p661_p5 = scmp.lt.s32.totalorder %s161_s25, %s161_s25 }
  0x15   : > { %p880_p11 = pnand %p584_p9, %p1047_p1  ;;  %p654_p13 = scmp.ne.s32.totalorder %s161_s25, %s653_s30 }
  0x16   : > { %p662_p7 = scmp.lt.s32.totalorder %s653_s30, %s653_s30 }
  0x17   : > { %p644_p12 = pneg %p880_p11 }
  0x18   : > { %p663_p10 = por %p662_p7, %p661_p5 }
  0x19   : > { %p656_p0 = pnand %p654_p13, %p644_p12 }
  0x1b   : > { %p657_p3 = pneg %p656_p0 }
  0x1d   : > { %p664_p2 = pnand %p663_p10, %p657_p3 }
  0x1f   : > { %667 = shalt.err (!%p664_p2)
}
  0x20   : > { %s799_s5 = smov 128   ;;  %s800_s6 = smov 8  }
  0x21   : > { %s1056_s2 = sld [smem:[#allocation13_spill]]  ;;  %p28_p9 = scmp.eq.s32.totalorder %s27_s29, 0 }
  0x22   : > { %p37_p12 = scmp.ne.s32.totalorder %s792_s17, %s788_s16  ;;  %p38_p10 = scmp.eq.s32.totalorder %s796_s18, 0 }
  0x23   : > { %p600_p2 = scmp.lt.s32.totalorder %s796_s18, 2  ;;  %p1057_p0 = scmp.eq.s32.totalorder %s852_s19, 1 }
  0x24   : > { %s902_s9 = scalar_select %p28_p9, %s792_s17, %s30_s28  }
  0x25   : > { %p39_p13 = por %p38_p10, %p37_p12  ;;  %p906_p3 = por %p1057_p0, %p37_p12 }
  0x26   : > { %s177_s11 = sand.u32 1, %s792_s17   ;;  %s507_s12 = sshll.u32 %s796_s18, 7 }
  0x27   : > { %587 = dma.hbm_to_vmem [thread:$0]  (!%p880_p11), %s1056_s2, 2048, %s161_s25, [#allocation6], %s799_s5, %s799_s5, %s800_s6  }
  0x28   : > { %s1058_s10 = scalar_select %p906_p3, 1, 0 }
  0x29   : > { %s912_s13 = sshll.u32 %s177_s11, 3  ;;  %s917_s24 = scalar_lea.hbm %s1042_s0, %s507_s12 }
  0x2a   : > { %s181_s25 = scalar_lea.vmem [#allocation2], %s912_s13  ;;  %p920_p11 = pnand %p600_p2, %p39_p13 }
  0x2b   : > { %s188_s26 = sshll.u32 %s181_s25, 4  ;;  %s927_s5 = scalar_lea.hbm %s1043_s1, %s507_s12  ;;  %s189_s26 = int_to_ptr.vmem [resolvable:$true] %s188_s26 }
  0x2c   : > { %s178_s6 = scalar_lea.sflag [#allocation3], %s177_s11  ;;  %s668_s7 = scalar_lea.hbm %s917_s24, 128 }
  0x2d   : > { %p669_p5 = scmp.ne.s32.totalorder %s917_s24, %s668_s7  ;;  %p670_p7 = pneg %p920_p11 }
  0x2e   : > { %s673_s20 = scalar_lea.hbm %s1042_s0, 256  ;;  %p674_p10 = scmp.lt.s32.totalorder %s917_s24, %s1042_s0 }
  0x2f   : > { %p671_p9 = pnand %p670_p7, %p669_p5  ;;  %p675_p2 = scmp.lt.s32.totalorder %s673_s20, %s668_s7 }
  0x31   : > { %p672_p12 = pneg %p671_p9  ;;  %p676_p13 = por %p675_p2, %p674_p10 }
  0x33   : > { %p677_p0 = pnand %p676_p13, %p672_p12 }
  0x35   : > { %680 = shalt.err (!%p677_p0)
}
  0x36   : > { %s681_s11 = scalar_lea.vmem %s189_s26, 128  ;;  %s801_s12 = smov [#allocation2]  }
  0x37   : > { %p682_p1 = scmp.ne.s32.totalorder %s189_s26, %s681_s11  ;;  %s686_s29 = sshll.u32 %s801_s12, 4  ;;  %s687_s29 = int_to_ptr.vmem [resolvable:$false] %s686_s29 }
  0x38   : > { %s688_s30 = scalar_lea.vmem %s687_s29, 256  ;;  %p689_p9 = scmp.lt.s32.totalorder %s189_s26, %s687_s29 }
  0x39   : > { %p684_p6 = pnand %p682_p1, %p670_p7  ;;  %p690_p3 = scmp.lt.s32.totalorder %s688_s30, %s681_s11 }
  0x3b   : > { %p685_p5 = pneg %p684_p6  ;;  %p691_p4 = por %p690_p3, %p689_p9 }
  0x3d   : > { %p692_p8 = pnand %p691_p4, %p685_p5 }
  0x3f   : > { %695 = shalt.err (!%p692_p8)
}
  0x40   : > { %591 = dma.hbm_to_vmem [thread:$0]  (!%p920_p11), %s917_s24, 128, %s189_s26, %s178_s6  }
  0x41   : > { %s195_s2 = sand.u32 1, %s796_s18   ;;  %s199_s7 = scalar_lea.vmem [#allocation5], %s912_s13 }
  0x42   : > { %s206_s8 = sshll.u32 %s199_s7, 4  ;;  %s196_s14 = scalar_lea.sflag [#allocation6], %s195_s2  ;;  %s207_s8 = int_to_ptr.vmem [resolvable:$true] %s206_s8 }
  0x43   : > { %s696_s20 = scalar_lea.hbm %s927_s5, 128  ;;  %s701_s12 = scalar_lea.hbm %s1043_s1, 256 }
  0x44   : > { %p697_p1 = scmp.ne.s32.totalorder %s927_s5, %s696_s20  ;;  %p702_p8 = scmp.lt.s32.totalorder %s927_s5, %s1043_s1 }
  0x45   : > { %p703_p3 = scmp.lt.s32.totalorder %s701_s12, %s696_s20 }
  0x46   : > { %p699_p4 = pnand %p697_p1, %p670_p7 }
  0x47   : > { %p704_p12 = por %p703_p3, %p702_p8 }
  0x48   : > { %p700_p6 = pneg %p699_p4 }
  0x4a   : > { %p705_p10 = pnand %p704_p12, %p700_p6 }
  0x4c   : > { %708 = shalt.err (!%p705_p10)
}
  0x4d   : > { %s709_s13 = scalar_lea.vmem %s207_s8, 128  ;;  %s802_s24 = smov [#allocation5]  }
  0x4e   : > { %p710_p2 = scmp.ne.s32.totalorder %s207_s8, %s709_s13  ;;  %s714_s26 = sshll.u32 %s802_s24, 4  ;;  %s715_s26 = int_to_ptr.vmem [resolvable:$false] %s714_s26 }
  0x4f   : > { %s716_s6 = scalar_lea.vmem %s715_s26, 256  ;;  %p717_p5 = scmp.lt.s32.totalorder %s207_s8, %s715_s26 }
  0x50   : > { %p712_p13 = pnand %p710_p2, %p670_p7  ;;  %p718_p9 = scmp.lt.s32.totalorder %s716_s6, %s709_s13 }
  0x52   : > { %p713_p0 = pneg %p712_p13  ;;  %p719_p1 = por %p718_p9, %p717_p5 }
  0x54   : > { %p720_p4 = pnand %p719_p1, %p713_p0 }
  0x56   : > { %723 = shalt.err (!%p720_p4)
}
  0x57   : > { %594 = dma.hbm_to_vmem [thread:$0]  (!%p920_p11), %s927_s5, 128, %s207_s8, %s196_s14  }
  0x58   : > { %p1060_p6 = scmp.ne.s32.totalorder %s1054_s23, 0 }
  0x59   : > { %s972_s2 = sand.u32 (!%p1060_p6), 1, %s788_s16   ;;  %p1061_p7 = scmp.ne.s32.totalorder (!%p1060_p6), %s1052_s21, 0 }
  0x5a   : > { %215 = sbr.rel (%p1060_p6) target bundleno = 515 (0x203), region = 36  ;;  %s975_s7 = sshll.u32 (!%p1060_p6), %s972_s2, 3 }
  0x5b   : > { %s218_s20 = scalar_lea.sflag (!%p1060_p6), [#allocation3], %s972_s2  ;;  %s221_s25 = scalar_lea.vmem (!%p1060_p6), [#allocation2], %s975_s7 }
  0x5f   : > { %767 = dma.done.wait (%p1061_p7), %s218_s20, 128  }
  0x60   : > { %769 = vsyncadd (%p1061_p7), %s218_s20, 4294967168  ;;  %s226_s23 = sand.u32 1, %s852_s19   ;;  %s230_s5 = scalar_lea.vmem [#allocation5], %s975_s7 }
  0x61   : > { %s227_s28 = scalar_lea.sflag [#allocation6], %s226_s23 }
  0x62   : > { %771 = dma.done.wait (%p1061_p7), %s227_s28, 128  }
  0x63   : > { %773 = vsyncadd (%p1061_p7), %s227_s28, 4294967168  ;;  %p1062_p11 = scmp.eq.s32.totalorder %s852_s19, 0 }
  0x65   : > { %775 = dma.done.wait (%p1062_p11), [#allocation6], 2048   ;;  %p1063_p8 = pmov %p1062_p11 }
  0x66   : > { %v803_v0 = vmov 0.0   ;;  %vm804_vm0 = vmmov 0   ;;  %v280_v1 = vld [vmem:[#allocation7 + $0x78] sm:$0xff]  ;;  %v279_v2 = vld [vmem:[#allocation7 + $0x70] sm:$0xff]  ;;  %v278_v3 = vld [vmem:[#allocation7 + $0x68] sm:$0xff]  ;;  %s519_s30 = sshll.u32 %s852_s19, 7 }
  0x67   : > { %777 = vsyncadd (%p1063_p8), [#allocation6], 4294965248  ;;  %539 = vmatprep.subr.mxu0 %v803_v0  ;;  %571 = vmatprep.mubr.msk.f32.mxu0 %vm804_vm0, %v803_v0  ;;  %v277_v4 = vld [vmem:[#allocation7 + $0x60] sm:$0xff]  ;;  %v276_v5 = vld [vmem:[#allocation7 + $0x58] sm:$0xff]  ;;  %s263_s13 = scalar_lea.vmem [#allocation8], %s975_s7  ;;  %s398_s20 = scalar_lea.hbm %s1046_s4, %s519_s30 }
  0x68   : > { %540 = vmatpush3.msra.mxu0 %v280_v1  ;;  %v275_v6 = vld [vmem:[#allocation7 + $0x50] sm:$0xff]  ;;  %v274_v7 = vld [vmem:[#allocation7 + $0x48] sm:$0xff]  ;;  %v273_v8 = vld [vmem:[#allocation7 + $0x40] sm:$0xff]  ;;  %s400_s24 = sshll.u32 %s263_s13, 4  ;;  %p1064_p12 = scmp.ne.s32.totalorder %s1058_s10, 0  ;;  %s401_s24 = int_to_ptr.vmem [resolvable:$true] %s400_s24 }
  0x69   : > { %541 = vmatprep.subr.mxu0 %v803_v0  ;;  %v272_v9 = vld [vmem:[#allocation7 + $0x38] sm:$0xff]  ;;  %v271_v10 = vld [vmem:[#allocation7 + $0x30] sm:$0xff]  ;;  %v270_v11 = vld [vmem:[#allocation7 + $0x28] sm:$0xff]  ;;  %s724_s23 = scalar_lea.vmem %s401_s24, 128  ;;  %s805_s28 = smov [#allocation8]  }
  0x6a   : > { %542 = vmatpush3.msra.mxu0 %v279_v2  ;;  %v269_v12 = vld [vmem:[#allocation7 + $0x20] sm:$0xff]  ;;  %v268_v13 = vld [vmem:[#allocation7 + $0x18] sm:$0xff]  ;;  %v267_v14 = vld [vmem:[#allocation7 + $0x10] sm:$0xff]  ;;  %p725_p3 = scmp.ne.s32.totalorder %s401_s24, %s724_s23 }
  0x6b   : > { %543 = vmatprep.subr.mxu0 %v803_v0  ;;  %v266_v15 = vld [vmem:[#allocation7 + $0x8] sm:$0xff]  ;;  %v265_v16 = vld [vmem:[#allocation7] sm:$0xff]  ;;  %v358_v20 = vld [vmem:[%s230_s5] sm:$0xff]  ;;  %s728_s5 = sshll.u32 %s805_s28, 4  ;;  %s729_s5 = int_to_ptr.vmem [resolvable:$false] %s728_s5 }
  0x6c   : > { %544 = vmatpush3.msra.mxu0 %v278_v3  ;;  %v264_v17 = vld [vmem:[%s221_s25] sm:$0xff]  ;;  %s387_s25 = scalar_lea.sflag [#allocation4], %s972_s2  ;;  %p726_p10 = pnand %p725_p3, %p1064_p12 }
  0x6d   : > { %545 = vmatprep.subr.mxu0 %v803_v0  ;;  %v515_v18 = vld [vmem:[%s1045_s3] ss:$0 sm:$0xff]  ;;  %v516_v35 = vld [vmem:[%s1045_s3 + $0x1] ss:$0 sm:$0xff]  ;;  %v517_v37 = vld [vmem:[%s1045_s3 + $0x2] ss:$0 sm:$0xff]  ;;  %p731_p13 = scmp.lt.s32.totalorder %s401_s24, %s729_s5 }
  0x6e   : > { %546 = vmatpush3.msra.mxu0 %v277_v4  ;;  %p727_p2 = pneg %p726_p10  ;;  %s730_s19 = scalar_lea.vmem %s729_s5, 256 }
  0x6f   : > { %547 = vmatprep.subr.mxu0 %v803_v0  ;;  %p732_p0 = scmp.lt.s32.totalorder %s730_s19, %s724_s23 }
  0x70   : > { %548 = vmatpush3.msra.mxu0 %v276_v5 }
  0x71   : > { %549 = vmatprep.subr.mxu0 %v803_v0  ;;  %p733_p5 = por %p732_p0, %p731_p13 }
  0x72   : > { %550 = vmatpush3.msra.mxu0 %v275_v6 }
  0x73   : > { %551 = vmatprep.subr.mxu0 %v803_v0  ;;  %p734_p9 = pnand %p733_p5, %p727_p2 }
  0x74   : > { %552 = vmatpush3.msra.mxu0 %v274_v7 }
  0x75   : > { %553 = vmatprep.subr.mxu0 %v803_v0 }
  0x76   : > { %554 = vmatpush3.msra.mxu0 %v273_v8 }
  0x77   : > { %555 = vmatprep.subr.mxu0 %v803_v0 }
  0x78   : > { %556 = vmatpush3.msra.mxu0 %v272_v9 }
  0x79   : > { %557 = vmatprep.subr.mxu0 %v803_v0 }
  0x7a   : > { %558 = vmatpush3.msra.mxu0 %v271_v10 }
  0x7b   : > { %559 = vmatprep.subr.mxu0 %v803_v0 }
  0x7c   : > { %560 = vmatpush3.msra.mxu0 %v270_v11 }
  0x7d   : > { %561 = vmatprep.subr.mxu0 %v803_v0 }
  0x7e   : > { %562 = vmatpush3.msra.mxu0 %v269_v12 }
  0x7f   : > { %563 = vmatprep.subr.mxu0 %v803_v0 }
  0x80   : > { %564 = vmatpush3.msra.mxu0 %v268_v13 }
  0x81   : > { %565 = vmatprep.subr.mxu0 %v803_v0 }
  0x82   : > { %566 = vmatpush3.msra.mxu0 %v267_v14 }
  0x83   : > { %567 = vmatprep.subr.mxu0 %v803_v0 }
  0x84   : > { %568 = vmatpush3.msra.mxu0 %v266_v15 }
  0x85   : > { %569 = vmatprep.subr.mxu0 %v803_v0 }
  0x86   : > { %570 = vmatpush3.msra.mxu0 %v265_v16 }
  0x87   : > { %572 = vmatmul.mubr.f32.vlgmr.msra.gmra.mxu0 %v264_v17 }
 0x147   : > { %v354_v19 = vpop.f32.mrf.mxu0 }
 0x148   : > { %v355_v21 = vadd.f32 %v515_v18, %v354_v19 }
 0x149   : > { %v573_v22 = vpop.f32.mrf.mxu0 }
 0x14a   : > { %v359_v23 = vadd.f32 %v358_v20, %v355_v21 }
 0x14c   : > { %360 = vadd.xlane.f32.xlu0 %v359_v23  ;;  %v364_v24 = vmul.f32 %v359_v23, %v359_v23 }
 0x150   : > { %365 = vadd.xlane.f32.xlu0 %v364_v24 }
 0x1d5   : > { %v361_v25 = vpop.xlane.xlu0 %360 }
 0x1d6   : > { %v363_v26 = vmul.f32 0.0078125, %v361_v25 }
 0x1d8   : > { %v368_v28 = vmul.f32 %v363_v26, %v363_v26  ;;  %v373_v33 = vsub.f32 %v359_v23, %v363_v26 }
 0x1d9   : > { %v366_v27 = vpop.xlane.xlu0 %365 }
 0x1da   : > { %v367_v29 = vmul.f32 0.0078125, %v366_v27 }
 0x1dc   : > { %v369_v30 = vsub.f32 %v367_v29, %v368_v28 }
 0x1de   : > { %v370_v31 = vmax.f32 %v369_v30, 0.0 }
 0x1e0   : > { %v371_v32 = vadd.f32 1e-12, %v370_v31 }
 0x1e2   : > { %640 = vrsqrt.f32 %v371_v32 }
 0x1ef   : > { %v641_v34 = vpop.eup %640 }
 0x1f0   : > { %v374_v36 = vmul.f32 %v641_v34, %v373_v33 }
 0x1f2   : > { %v379_v38 = vmul.f32 %v516_v35, %v374_v36 }
 0x1f4   : > { %v384_v39 = vadd.f32 %v517_v37, %v379_v38 }
 0x1f6   : > { %385 = vst [vmem:[%s263_s13] sm:$0xff] %v384_v39 }
 0x1f7   : > { %737 = shalt.err (!%p734_p9)
}
 0x1f8   : > { %s738_s7 = scalar_lea.hbm %s398_s20, 128  ;;  %s742_s8 = scalar_lea.hbm %s1046_s4, 256 }
 0x1f9   : > { %p739_p1 = scmp.ne.s32.totalorder %s398_s20, %s738_s7  ;;  %p743_p7 = scmp.lt.s32.totalorder %s398_s20, %s1046_s4 }
 0x1fa   : > { %p744_p11 = scmp.lt.s32.totalorder %s742_s8, %s738_s7 }
 0x1fb   : > { %p740_p4 = pnand %p739_p1, %p1064_p12 }
 0x1fc   : > { %p745_p8 = por %p744_p11, %p743_p7 }
 0x1fd   : > { %p741_p6 = pneg %p740_p4 }
 0x1ff   : > { %p746_p3 = pnand %p745_p8, %p741_p6 }
 0x201   : > { %749 = shalt.err (!%p746_p3)
}
 0x202   : > { %582 = dma.vmem_to_hbm [thread:$0]  (%p1064_p12), %s401_s24, 128, %s398_s20, %s387_s25  }
 0x203 PF: > { %s412_s12 = sand.u32 1, %s784_s15   ;;  %p1065_p10 = scmp.ne.s32.totalorder %s1053_s22, 0 }
 0x204   : > { %p1066_p2 = scmp.ge.s32.totalorder %s796_s18, 2  ;;  %s413_s29 = scalar_lea.sflag [#allocation4], %s412_s12 }
 0x206   : > { %p596_p13 = pnand %p1066_p2, %p1065_p10 }
 0x208   : > { %p597_p0 = pneg %p596_p13 }
 0x20a   : > { %779 = dma.done.wait (%p597_p0), %s413_s29, 128  }
 0x20b   : > { %781 = vsyncadd (%p597_p0), %s413_s29, 4294967168  ;;  %p20_p5 = scmp.ge.s32.totalorder %s885_s27, 4   ;;  %s1067_s15 = smov %s788_s16 }
 0x20c   : > { %s1068_s16 = smov %s792_s17  ;;  %s1069_s17 = smov %s902_s9 }
 0x20d   : > { %s1070_s18 = smov %s885_s27  ;;  %22 = sbr.rel (!%p20_p5) target bundleno = 9 (0x9), region = 98 }
 0x212   :  { %418 = vsyncpa [#allocation3], 1 }
 0x213   :  { %420 = vsyncpa [#allocation3 + $0x1], 1 }
 0x214   :  { %421 = vsyncpa [#allocation6], 1 }
 0x215   :  { %423 = vsyncpa [#allocation6 + $0x1], 1 }
 0x216   :  { %424 = vsyncpa [#allocation4], 1 }
 0x217   :  { %426 = vsyncpa [#allocation4 + $0x1], 1 }

</bundles_post_ra>
